<compile_context>
chip_gen: v7x
topology: tpu7x:2x2x1
jax: 0.10.0
libtpu: 0.0.40
codegen_flags: <defaults>
</compile_context>

<pallas_src>
import functools

import jax
import jax.numpy as jnp
from jax.experimental import pallas as pl
from jax.experimental.pallas import tpu as pltpu

LANE = 128              # TPU lane width; final output dim padded to this for unmasked stores.
TM_MAX = 2048           # max batch-tile rows; f32 footprint ~4 MiB double-buffered (<< VMEM).
MIN_PALLAS_BATCH = 256  # below this, XLA's fused matmul path beats the custom kernel.


def _round_up(x, m):
    return ((x + m - 1) // m) * m


def mlp_kernel(x_ref, w1_ref, b1_ref, w2_ref, b2_ref, w3_ref, b3_ref, o_ref):
    # Fully fused hot path on one batch tile: three matmuls + bias + ReLU.
    # Every K/N already fits a single MXU tile, so no reduction grid axis /
    # accumulator scratch is needed and everything stays float32.
    x = x_ref[...]
    h1 = jnp.dot(x, w1_ref[...], preferred_element_type=jnp.float32) + b1_ref[...]
    h1 = jnp.maximum(h1, 0.0)
    h2 = jnp.dot(h1, w2_ref[...], preferred_element_type=jnp.float32) + b2_ref[...]
    h2 = jnp.maximum(h2, 0.0)
    out = jnp.dot(h2, w3_ref[...], preferred_element_type=jnp.float32) + b3_ref[...]
    o_ref[...] = out.astype(o_ref.dtype)


def prepare_params(w1, b1, w2, b2, w3, b3):
    """Hoisted out of the per-call path: pad the final layer to 128 output lanes ONCE.

    Returns (params_tuple, num_targets); params_tuple feeds mlp_forward directly.
    """
    num_targets = w3.shape[1]
    w3p = jnp.zeros((w3.shape[0], LANE), w3.dtype).at[:, :num_targets].set(w3)
    b3p = jnp.zeros((1, LANE), b3.dtype).at[:, :num_targets].set(b3)
    return (w1, b1, w2, b2, w3p, b3p), num_targets


def _choose_tile(b_pad, tm_max):
    """Batch tile giving an even (>=2 when possible) number of balanced grid steps,
    so both v7x TensorCores get work under ("parallel",) semantics."""
    steps = pl.cdiv(b_pad, tm_max)
    if steps % 2:
        steps += 1
    return _round_up(pl.cdiv(b_pad, steps), 8)


@functools.partial(jax.jit, static_argnames=("num_targets", "tm_max", "min_pallas_batch"))
def mlp_forward(x, params, *, num_targets, tm_max=TM_MAX, min_pallas_batch=MIN_PALLAS_BATCH):
    """x: [B, F_in]; params from prepare_params() -> [B, num_targets] float32."""
    w1, b1, w2, b2, w3p, b3p = params
    B = x.shape[0]

    # Small-batch fast path: launch/pad/slice overhead dominates below a few hundred rows.
    if B < min_pallas_batch:
        h = jnp.maximum(x @ w1 + b1, 0.0)
        h = jnp.maximum(h @ w2 + b2, 0.0)
        return (h @ w3p + b3p)[:, :num_targets]

    # Pad the batch only to a multiple of 8 (sublane alignment); at most 7 extra rows.
    b_pad = _round_up(B, 8)
    if b_pad != B:
        x = jnp.pad(x, ((0, b_pad - B), (0, 0)))

    tm = _choose_tile(b_pad, tm_max)
    # Ragged last block is safe: every output row depends only on its own input row,
    # Pallas masks the partial store, and padded rows are sliced off below.
    grid = (pl.cdiv(b_pad, tm),)

    full = lambda a: pl.BlockSpec(a.shape, lambda i: (0,) * a.ndim)

    out_padded = pl.pallas_call(
        mlp_kernel,
        out_shape=jax.ShapeDtypeStruct((b_pad, LANE), jnp.float32),
        grid=grid,
        in_specs=[
            pl.BlockSpec((tm, x.shape[1]), lambda i: (i, 0)),  # x: tiled over batch
            full(w1), full(b1),                                # tiny resident weights/biases
            full(w2), full(b2),
            full(w3p), full(b3p),
        ],
        out_specs=pl.BlockSpec((tm, LANE), lambda i: (i, 0)),  # lane-dense unmasked store
        compiler_params=pltpu.CompilerParams(
            dimension_semantics=("parallel",),  # shard grid steps across v7x's 2 TCs
        ),
    )(x, w1, b1, w2, b2, w3p, b3p)

    # Remove batch padding and output-lane padding (fused into the jitted executable).
    return out_padded[:B, :num_targets]


def init_linear_params(key, in_features, out_features):
    """Deterministic init matching torch.nn.Linear's default uniform(-1/sqrt(in), 1/sqrt(in)).
    Returns (W_T [in, out], b [1, out])."""
    kw, kb = jax.random.split(key)
    bound = 1.0 / (in_features ** 0.5)
    w_t = jax.random.uniform(kw, (in_features, out_features), jnp.float32, -bound, bound)
    b = jax.random.uniform(kb, (1, out_features), jnp.float32, -bound, bound)
    return w_t, b


def _reference(x, w1, b1, w2, b2, w3, b3):
    h = jnp.maximum(x @ w1 + b1, 0.0)
    h = jnp.maximum(h @ w2 + b2, 0.0)
    return h @ w3 + b3


if __name__ == "__main__":
    num_input_features = 2
    num_neurons_layer1 = 20
    num_neurons_layer2 = 10
    num_targets = 2

    root = jax.random.PRNGKey(0)
    k_x, k1, k2, k3 = jax.random.split(root, 4)

    w1, b1 = init_linear_params(k1, num_input_features, num_neurons_layer1)
    w2, b2 = init_linear_params(k2, num_neurons_layer1, num_neurons_layer2)
    w3, b3 = init_linear_params(k3, num_neurons_layer2, num_targets)
    params, nt = prepare_params(w1, b1, w2, b2, w3, b3)

    # 1) Small batch, forced through the Pallas kernel (min_pallas_batch=0).
    x_small = jax.random.normal(k_x, (8, num_input_features), jnp.float32)
    out_small = jax.block_until_ready(
        mlp_forward(x_small, params, num_targets=nt, min_pallas_batch=0))
    ref_small = _reference(x_small, w1, b1, w2, b2, w3, b3)
    assert out_small.shape == (8, num_targets)
    assert jnp.allclose(out_small, ref_small, atol=1e-5, rtol=1e-5)

    # 2) Larger batch via the default Pallas path: even 2-step parallel grid,
    #    ragged last block (2600 % 1304 != 0), no batch padding copy.
    x_big = jax.random.normal(jax.random.PRNGKey(1), (2600, num_input_features), jnp.float32)
    out_big = jax.block_until_ready(mlp_forward(x_big, params, num_targets=nt))
    ref_big = _reference(x_big, w1, b1, w2, b2, w3, b3)
    assert out_big.shape == (2600, num_targets)
    assert jnp.allclose(out_big, ref_big, atol=1e-5, rtol=1e-5)

    # 3) Batch not a multiple of 8: exercises the minimal (<=7 row) batch pad.
    x_odd = jax.random.normal(jax.random.PRNGKey(2), (1043, num_input_features), jnp.float32)
    out_odd = jax.block_until_ready(mlp_forward(x_odd, params, num_targets=nt))
    ref_odd = _reference(x_odd, w1, b1, w2, b2, w3, b3)
    assert out_odd.shape == (1043, num_targets)
    assert jnp.allclose(out_odd, ref_odd, atol=1e-5, rtol=1e-5)

    # 4) Small batch via the default (fast) path: bypasses the kernel, same result.
    out_fast = jax.block_until_ready(mlp_forward(x_small, params, num_targets=nt))
    assert jnp.allclose(out_fast, ref_small, atol=1e-5, rtol=1e-5)

    print("KERNEL_OK")
</pallas_src>

<mosaic_0001>
module attributes {stable_mosaic.version = 11 : i64} {
  func.func @mlp_kernel(%arg0: i32, %arg1: memref<8x2xf32, #tpu.memory_space<vmem>>, %arg2: memref<2x20xf32, #tpu.memory_space<vmem>>, %arg3: memref<1x20xf32, #tpu.memory_space<vmem>>, %arg4: memref<20x10xf32, #tpu.memory_space<vmem>>, %arg5: memref<1x10xf32, #tpu.memory_space<vmem>>, %arg6: memref<10x128xf32, #tpu.memory_space<vmem>>, %arg7: memref<1x128xf32, #tpu.memory_space<vmem>>, %arg8: memref<8x128xf32, #tpu.memory_space<vmem>>) attributes {dimension_semantics = [#tpu.dimension_semantics<parallel>], iteration_bounds = array<i64: 1>, scalar_prefetch = 0 : i64, scratch_operands = 0 : i64, tpu.core_type = #tpu.core_type<tc>, window_params = [{transform_indices = @transform_0, window_bounds = array<i64: 8, 2>}, {pipeline_mode = #tpu.pipeline_mode<synchronous>, transform_indices = @transform_1, window_bounds = array<i64: 2, 20>}, {pipeline_mode = #tpu.pipeline_mode<synchronous>, transform_indices = @transform_2, window_bounds = array<i64: 1, 20>}, {pipeline_mode = #tpu.pipeline_mode<synchronous>, transform_indices = @transform_3, window_bounds = array<i64: 20, 10>}, {pipeline_mode = #tpu.pipeline_mode<synchronous>, transform_indices = @transform_4, window_bounds = array<i64: 1, 10>}, {pipeline_mode = #tpu.pipeline_mode<synchronous>, transform_indices = @transform_5, window_bounds = array<i64: 10, 128>}, {pipeline_mode = #tpu.pipeline_mode<synchronous>, transform_indices = @transform_6, window_bounds = array<i64: 1, 128>}, {transform_indices = @transform_7, window_bounds = array<i64: 8, 128>}]} {
    %c0 = arith.constant 0 : index
    %c0_0 = arith.constant 0 : index
    %0 = vector.load %arg1[%c0, %c0_0] : memref<8x2xf32, #tpu.memory_space<vmem>>, vector<8x2xf32>
    %c0_1 = arith.constant 0 : index
    %c0_2 = arith.constant 0 : index
    %1 = vector.load %arg2[%c0_1, %c0_2] : memref<2x20xf32, #tpu.memory_space<vmem>>, vector<2x20xf32>
    %cst = arith.constant dense<0.000000e+00> : vector<8x20xf32>
    %2 = tpu.matmul %0, %1, %cst {dimension_numbers = #tpu.dot_dimension_numbers<[1], [0], [0], [1], [0, 0, 1, 1], [], []>} : vector<8x2xf32>, vector<2x20xf32>, vector<8x20xf32> -> vector<8x20xf32>
    %c0_3 = arith.constant 0 : index
    %c0_4 = arith.constant 0 : index
    %3 = vector.load %arg3[%c0_3, %c0_4] : memref<1x20xf32, #tpu.memory_space<vmem>>, vector<1x20xf32>
    %4 = vector.broadcast %3 : vector<1x20xf32> to vector<8x20xf32>
    %5 = arith.addf %2, %4 : vector<8x20xf32>
    %cst_5 = arith.constant 0.000000e+00 : f32
    %6 = vector.broadcast %cst_5 : f32 to vector<8x20xf32>
    %7 = arith.maximumf %5, %6 : vector<8x20xf32>
    %c0_6 = arith.constant 0 : index
    %c0_7 = arith.constant 0 : index
    %8 = vector.load %arg4[%c0_6, %c0_7] : memref<20x10xf32, #tpu.memory_space<vmem>>, vector<20x10xf32>
    %cst_8 = arith.constant dense<0.000000e+00> : vector<8x10xf32>
    %9 = tpu.matmul %7, %8, %cst_8 {dimension_numbers = #tpu.dot_dimension_numbers<[1], [0], [0], [1], [0, 0, 1, 1], [], []>} : vector<8x20xf32>, vector<20x10xf32>, vector<8x10xf32> -> vector<8x10xf32>
    %c0_9 = arith.constant 0 : index
    %c0_10 = arith.constant 0 : index
    %10 = vector.load %arg5[%c0_9, %c0_10] : memref<1x10xf32, #tpu.memory_space<vmem>>, vector<1x10xf32>
    %11 = vector.broadcast %10 : vector<1x10xf32> to vector<8x10xf32>
    %12 = arith.addf %9, %11 : vector<8x10xf32>
    %cst_11 = arith.constant 0.000000e+00 : f32
    %13 = vector.broadcast %cst_11 : f32 to vector<8x10xf32>
    %14 = arith.maximumf %12, %13 : vector<8x10xf32>
    %c0_12 = arith.constant 0 : index
    %c0_13 = arith.constant 0 : index
    %15 = vector.load %arg6[%c0_12, %c0_13] : memref<10x128xf32, #tpu.memory_space<vmem>>, vector<10x128xf32>
    %cst_14 = arith.constant dense<0.000000e+00> : vector<8x128xf32>
    %16 = tpu.matmul %14, %15, %cst_14 {dimension_numbers = #tpu.dot_dimension_numbers<[1], [0], [0], [1], [0, 0, 1, 1], [], []>} : vector<8x10xf32>, vector<10x128xf32>, vector<8x128xf32> -> vector<8x128xf32>
    %c0_15 = arith.constant 0 : index
    %c0_16 = arith.constant 0 : index
    %17 = vector.load %arg7[%c0_15, %c0_16] : memref<1x128xf32, #tpu.memory_space<vmem>>, vector<1x128xf32>
    %18 = vector.broadcast %17 : vector<1x128xf32> to vector<8x128xf32>
    %19 = arith.addf %16, %18 : vector<8x128xf32>
    %c0_17 = arith.constant 0 : index
    %c0_18 = arith.constant 0 : index
    %20 = vector.load %arg8[%c0_17, %c0_18] : memref<8x128xf32, #tpu.memory_space<vmem>>, vector<8x128xf32>
    tpu.vector_store %arg8[%c0_17, %c0_18], %19 {strides = array<i32>} : memref<8x128xf32, #tpu.memory_space<vmem>>, vector<8x128xf32>,
    return
  }
  func.func @transform_0(%arg0: i32) -> (i32, i32) {
    %c0_i32 = arith.constant 0 : i32
    %c0_i32_0 = arith.constant 0 : i32
    return %arg0, %c0_i32 : i32, i32
  }
  func.func @transform_1(%arg0: i32) -> (i32, i32) {
    %c0_i32 = arith.constant 0 : i32
    %c0_i32_0 = arith.constant 0 : i32
    %c0_i32_1 = arith.constant 0 : i32
    return %c0_i32, %c0_i32_0 : i32, i32
  }
  func.func @transform_2(%arg0: i32) -> (i32, i32) {
    %c0_i32 = arith.constant 0 : i32
    %c0_i32_0 = arith.constant 0 : i32
    %c0_i32_1 = arith.constant 0 : i32
    return %c0_i32, %c0_i32_0 : i32, i32
  }
  func.func @transform_3(%arg0: i32) -> (i32, i32) {
    %c0_i32 = arith.constant 0 : i32
    %c0_i32_0 = arith.constant 0 : i32
    %c0_i32_1 = arith.constant 0 : i32
    return %c0_i32, %c0_i32_0 : i32, i32
  }
  func.func @transform_4(%arg0: i32) -> (i32, i32) {
    %c0_i32 = arith.constant 0 : i32
    %c0_i32_0 = arith.constant 0 : i32
    %c0_i32_1 = arith.constant 0 : i32
    return %c0_i32, %c0_i32_0 : i32, i32
  }
  func.func @transform_5(%arg0: i32) -> (i32, i32) {
    %c0_i32 = arith.constant 0 : i32
    %c0_i32_0 = arith.constant 0 : i32
    %c0_i32_1 = arith.constant 0 : i32
    return %c0_i32, %c0_i32_0 : i32, i32
  }
  func.func @transform_6(%arg0: i32) -> (i32, i32) {
    %c0_i32 = arith.constant 0 : i32
    %c0_i32_0 = arith.constant 0 : i32
    %c0_i32_1 = arith.constant 0 : i32
    return %c0_i32, %c0_i32_0 : i32, i32
  }
  func.func @transform_7(%arg0: i32) -> (i32, i32) {
    %c0_i32 = arith.constant 0 : i32
    %c0_i32_0 = arith.constant 0 : i32
    return %arg0, %c0_i32 : i32, i32
  }
}

</mosaic_0001>

<bundles_post_ra>
// kernel: mlp_forward.1
= control target key start
LH: loop header
LB: loop body
LE: loop exit
PB: predicated region body
PF: predicated region fallthrough
CT: control target
= control target key end

     0   :  { %vm39_vm0 = vcmask 1041408   ;;  %v344_v0 = vmov 0.0   ;;  %vm345_vm1 = vmmov 0   ;;  %vm35_vm2 = vcmask 15360   ;;  %s423_s1 = inlined_call_operand.vmem [shape: f32[2,20], index: 1, kind: input, shape index: {}]   ;;  %s424_s0 = inlined_call_operand.vmem [shape: f32[8,2], index: 0, kind: input, shape index: {}]   ;;  %s425_s3 = inlined_call_operand.vmem [shape: f32[20,10], index: 3, kind: input, shape index: {}]   ;;  %s426_s2 = inlined_call_operand.vmem [shape: f32[1,20], index: 2, kind: input, shape index: {}]   ;;  %s427_s5 = inlined_call_operand.vmem [shape: f32[10,128], index: 5, kind: input, shape index: {}]   ;;  %s428_s4 = inlined_call_operand.vmem [shape: f32[1,10], index: 4, kind: input, shape index: {}]   ;;  %s429_s6 = inlined_call_operand.vmem [shape: f32[1,128], index: 6, kind: input, shape index: {}]   ;;  %s430_s7 = inlined_call_operand.vmem [shape: f32[8,128], index: 7, kind: output, shape index: {}]  }
   0x1   :  { %312 = vmatprep.subr.mxu0 %v344_v0  ;;  %v27_v1 = vld [vmem:[%s423_s1] sm:$0x3]  ;;  %314 = vmatprep.mubr.msk.f32.mxu0 %vm345_vm1, %v344_v0  ;;  %v346_v3 = vmov 0.0|0.0   ;;  %v115_v5 = vld [vmem:[%s425_s3 + $0x8] sm:$0xff]  ;;  %v116_v7 = vld [vmem:[%s425_s3 + $0x10] sm:$0xf] }
   0x2   :  { %v26_v2 = vld [vmem:[%s424_s0] sm:$0xff]  ;;  %313 = vmatpush3.msk.msra.mxu0 %vm39_vm0, %v27_v1  ;;  %333 = vmatprep.subr.bf16.mxu1 %v346_v3  ;;  %vm128_vm3 = vcmask 1043456   ;;  %vm124_vm4 = vcmask 162816   ;;  %vm347_vm5 = vmmov 1   ;;  %v204_v14 = vld [vmem:[%s427_s5 + $0x8] sm:$0x3] }
   0x3   :  { %315 = vmatmul.mubr.msk.f32.vlgmr.msra.gmra.mrb[0].mxu0 %vm35_vm2, %v26_v2  ;;  %323 = vmatprep.mubr.msk.f32.mxu1 %vm345_vm1, %v344_v0  ;;  %v114_v4 = vld [vmem:[%s425_s3] sm:$0xff]  ;;  %vm338_vm6 = vmpackc.low %vm39_vm0, %vm347_vm5  ;;  %vm212_vm7 = vcmask 80896  }
   0x4   :  { %336 = vmatprep.subr.bf16.mxu0 %v346_v3  ;;  %330 = vmatprep.mubr.msk.f32.mxu0 %vm345_vm1, %v344_v0  ;;  %v334_v6 = vpack.c.bf16 %v115_v5, %v114_v4  ;;  %v294_v8 = vld [vmem:[%s426_s2] ss:$0 sm:$0xff] }
   0x5   :  { %v203_v13 = vld [vmem:[%s427_s5] sm:$0xff] }
   0x6   :  { %335 = vmatpush3.bf16.msra.mxu1 %v334_v6  ;;  %v337_v15 = vpack.c.bf16 %v204_v14, %v203_v13  ;;  %v297_v16 = vld [vmem:[%s428_s4] ss:$0 sm:$0xff] }
   0x7   :  { %321 = vmatprep.subr.mxu1 %v344_v0  ;;  %v300_v21 = vld [vmem:[%s429_s6] ss:$0 sm:$0xff] }
   0x8   :  { %339 = vmatpush3.bf16.msk.msra.mxu0 %vm338_vm6, %v337_v15 }
   0xa   :  { %322 = vmatpush3.msk.msra.mxu1 %vm128_vm3, %v116_v7 }
  0xd6   :  { %v109_v9 = vpop.f32.mrb[0].mxu0 }
  0xd7   :  { %v110_v10 = vadd.f32 %v294_v8, %v109_v9  ;;  %v316_v11 = vpop.f32.mrb[1].mxu0 }
  0xd9   :  { %v113_v12 = vmax.f32 %v110_v10, 0.0 }
  0xdb   :  { %324 = vmatmul.mubr.msk.f32.vlgmr.msra.gmra.mrb[0].mxu1 %vm124_vm4, %v113_v12 }
 0x1ae   :  { %v198_v17 = vpop.f32.mrb[0].mxu1 }
 0x1af   :  { %v199_v18 = vadd.f32 %v297_v16, %v198_v17  ;;  %v325_v19 = vpop.f32.mrb[1].mxu1 }
 0x1b1   :  { %v202_v20 = vmax.f32 %v199_v18, 0.0 }
 0x1b3   :  { %331 = vmatmul.mubr.msk.f32.vlgmr.msra.gmra.mrb[2].mxu0 %vm212_vm7, %v202_v20 }
 0x286   :  { %v285_v22 = vpop.f32.mrb[2].mxu0 }
 0x287   :  { %v286_v23 = vadd.f32 %v300_v21, %v285_v22  ;;  %v332_v24 = vpop.f32.mrb[3].mxu0 }
 0x289   :  { %289 = vst [vmem:[%s430_s7] sm:$0xff] %v286_v23 }

</bundles_post_ra>
